<compile_context>
chip_gen: v7x
topology: tpu7x:2x2x1
jax: 0.10.0
libtpu: 0.0.40
codegen_flags: <defaults>
</compile_context>

<pallas_src>
import functools
import math

import jax
import jax.numpy as jnp
from jax import lax
from jax.experimental import pallas as pl
from jax.experimental.pallas import tpu as pltpu


# ---------------------------------------------------------------------------
# tiling helper: largest multiple of `granule` <= preferred that divides dim,
# otherwise fall back to the full dim (full-dim blocks are always legal).
# ---------------------------------------------------------------------------
def _pick_tile(dim, preferred, granule):
    if dim <= preferred:
        return dim
    cand = (preferred // granule) * granule
    while cand >= granule:
        if dim % cand == 0:
            return cand
        cand -= granule
    return dim


# ---------------------------------------------------------------------------
# Kernel 1: tiled linear layer  y = x @ W + b   (W already (D_in, D_out))
#   grid = (M/tm, N/tn, K/tk); f32 VMEM accumulator; init/finalize via pl.when
# ---------------------------------------------------------------------------
def _linear_kernel(x_ref, w_ref, b_ref, o_ref, acc_ref):
    @pl.when(pl.program_id(2) == 0)
    def _():
        acc_ref[...] = jnp.zeros_like(acc_ref)

    # TODO(synk): optionally feed the MXU bf16 x/w (with f32 accumulation) on
    # v6e/v7x for ~4x matmul throughput if the precision budget allows.
    acc_ref[...] += jnp.dot(
        x_ref[...], w_ref[...], preferred_element_type=jnp.float32
    )

    @pl.when(pl.program_id(2) == pl.num_programs(2) - 1)
    def _():
        o_ref[...] = (acc_ref[...] + b_ref[...]).astype(o_ref.dtype)


def pallas_linear(x2d, w, b, *, tm_pref=256, tn_pref=256, tk_pref=512):
    """x2d: (M, K) f32; w: (K, N) f32 (pre-transposed); b: (N,) f32."""
    M, K = x2d.shape
    N = w.shape[1]
    # Tile sizes budgeted against v7x's 64 MiB VMEM (double-buffered
    # 256x512 + 512x256 + 256x256 f32 ~= 2.6 MiB). Lane-dim tiles are kept
    # 128-granular; sublane-dim 8-granular; small dims use full-extent blocks.
    tm = _pick_tile(M, tm_pref, 8)
    tn = _pick_tile(N, tn_pref, 128)
    tk = _pick_tile(K, tk_pref, 128)
    grid = (M // tm, N // tn, K // tk)
    b2d = b.reshape(1, N)

    return pl.pallas_call(
        _linear_kernel,
        out_shape=jax.ShapeDtypeStruct((M, N), jnp.float32),
        grid_spec=pltpu.PrefetchScalarGridSpec(
            num_scalar_prefetch=0,
            grid=grid,
            in_specs=[
                pl.BlockSpec((tm, tk), lambda i, j, k: (i, k)),
                pl.BlockSpec((tk, tn), lambda i, j, k: (k, j)),
                pl.BlockSpec((1, tn), lambda i, j, k: (0, j)),
            ],
            out_specs=pl.BlockSpec((tm, tn), lambda i, j, k: (i, j)),
            scratch_shapes=[pltpu.VMEM((tm, tn), jnp.float32)],
        ),
        compiler_params=pltpu.CompilerParams(
            dimension_semantics=("parallel", "parallel", "arbitrary"),
            vmem_limit_bytes=32 * 1024 * 1024,
        ),
    )(x2d, w, b2d)


# ---------------------------------------------------------------------------
# Kernel 2: scaled dot-product attention.
#   One grid step per batch element; all heads processed per step (mask tile
#   stays resident across heads, ~0.35us/step overhead amortized). Inputs and
#   the attention output stay in (B, S, D) layout; the head split is a static
#   in-kernel slice of the d_model axis, so the wrapper needs no transposes.
# ---------------------------------------------------------------------------
def _sdpa_kernel(q_ref, k_ref, v_ref, m_ref, o_ref, *w_refs,
                 num_heads, head_dim):
    scale = 1.0 / math.sqrt(float(head_dim))
    q_all = q_ref[0] * scale          # fold 1/sqrt(Dh) into q: O(S*D), not O(S^2)
    k_all = k_ref[0]
    v_all = v_ref[0]
    mask_bias = m_ref[0, 0] * (-1.0e9)   # (S, S), loaded once, reused by all heads

    # q @ k^T via dot_general contracting the last dims of both operands:
    # no explicit k transpose (keeps the XLU free for the softmax reductions).
    dn = (((1,), (1,)), ((), ()))

    # TODO(synk): for long sequences (S >= ~1024 on v7x) switch to flash-style
    # KV tiling (online softmax with m/l/acc scratch) instead of materializing
    # full (S, S) scores per head.
    head_outs = []
    for h in range(num_heads):
        lo, hi = h * head_dim, (h + 1) * head_dim
        qh = q_all[:, lo:hi]
        kh = k_all[:, lo:hi]
        vh = v_all[:, lo:hi]

        scores = lax.dot_general(qh, kh, dimension_numbers=dn,
                                 preferred_element_type=jnp.float32)
        scores = scores + mask_bias

        # numerically-stable softmax (matches F.softmax); divide goes to the
        # EUP via an approx reciprocal (free VLIW slot).
        mx = jnp.max(scores, axis=-1, keepdims=True)
        e = jnp.exp(scores - mx)
        denom = jnp.sum(e, axis=-1, keepdims=True)
        p = e * pl.reciprocal(denom, approx=True)

        if w_refs:  # attention-weights output is optional (big HBM writeback)
            w_refs[0][0, h] = p.astype(w_refs[0].dtype)

        head_outs.append(jnp.dot(p, vh, preferred_element_type=jnp.float32))

    # single lane-dense store of the merged-head output (one unmasked vst
    # stream instead of H masked sub-128-lane partial stores).
    o_ref[0] = jnp.concatenate(head_outs, axis=-1).astype(o_ref.dtype)


def pallas_sdpa(q, k, v, mask, *, num_heads,
                return_attention_weights=True, weights_dtype=jnp.float32):
    """q, k, v: (B, S, D); mask: (B, 1, S, S).

    Returns out (B, S, D) and, optionally, attention weights (B, H, S, S).
    `weights_dtype=jnp.bfloat16` halves the weights writeback if needed.
    """
    B, S, D = q.shape
    H = num_heads
    Dh = D // H
    kernel = functools.partial(_sdpa_kernel, num_heads=H, head_dim=Dh)

    o_shape = jax.ShapeDtypeStruct((B, S, D), jnp.float32)
    o_spec = pl.BlockSpec((1, S, D), lambda b: (b, 0, 0))
    if return_attention_weights:
        out_shape = (o_shape, jax.ShapeDtypeStruct((B, H, S, S), weights_dtype))
        out_specs = (o_spec, pl.BlockSpec((1, H, S, S), lambda b: (b, 0, 0, 0)))
    else:
        out_shape = o_shape
        out_specs = o_spec

    return pl.pallas_call(
        kernel,
        out_shape=out_shape,
        grid=(B,),
        in_specs=[
            pl.BlockSpec((1, S, D), lambda b: (b, 0, 0)),
            pl.BlockSpec((1, S, D), lambda b: (b, 0, 0)),
            pl.BlockSpec((1, S, D), lambda b: (b, 0, 0)),
            pl.BlockSpec((1, 1, S, S), lambda b: (b, 0, 0, 0)),  # bcast over heads
        ],
        out_specs=out_specs,
        compiler_params=pltpu.CompilerParams(
            dimension_semantics=("parallel",),
            vmem_limit_bytes=32 * 1024 * 1024,
        ),
    )(q, k, v, mask)


# ---------------------------------------------------------------------------
# Full forward pass (glue in plain JAX, hot paths in Pallas)
# ---------------------------------------------------------------------------
class MultiHeadAttentionPallas:
    def __init__(self, input_size, d_model, num_heads, dropout=0.1, *, key):
        assert d_model % num_heads == 0, "d_model must be divisible by num_heads"
        self.d_model = d_model
        self.num_heads = num_heads
        self.head_dim = d_model // num_heads
        # TODO(synk): nn.Dropout is declared in the PyTorch __init__ but never
        # applied in forward(), so it is intentionally omitted here.
        del input_size, dropout

        # nn.Linear default init U(-1/sqrt(fan_in), 1/sqrt(fan_in)).
        # Weights stored PRE-TRANSPOSED as (d_in, d_out): no per-call transpose.
        bound = 1.0 / math.sqrt(d_model)
        keys = jax.random.split(key, 8)

        def u(kk, shape):
            return jax.random.uniform(kk, shape, jnp.float32, -bound, bound)

        self.weights = [u(keys[i], (d_model, d_model)) for i in range(4)]
        self.biases = [u(keys[4 + i], (d_model,)) for i in range(4)]

    def __call__(self, query, key, value, mask, *, return_attention_weights=True):
        B, S, D = query.shape
        H = self.num_heads

        # Q/K/V projections (tiled Pallas matmul); activations stay (B, S, D).
        qp, kp, vp = (
            pallas_linear(x.reshape(B * S, D), self.weights[i],
                          self.biases[i]).reshape(B, S, D)
            for i, x in enumerate((query, key, value))
        )

        attn = pallas_sdpa(qp, kp, vp, mask, num_heads=H,
                           return_attention_weights=return_attention_weights)
        if return_attention_weights:
            attn_out, attn_weights = attn
        else:
            attn_out, attn_weights = attn, None

        # output projection directly on the (B, S, D) attention output
        out = pallas_linear(attn_out.reshape(B * S, D), self.weights[3],
                            self.biases[3]).reshape(B, S, D)

        if return_attention_weights:
            return out, attn_weights
        return out


if __name__ == "__main__":
    B, S, D, H = 2, 8, 32, 4

    root = jax.random.PRNGKey(0)
    k_params, k_q, k_k, k_v = jax.random.split(root, 4)

    mha = MultiHeadAttentionPallas(input_size=D, d_model=D, num_heads=H,
                                   key=k_params)

    query = jax.random.normal(k_q, (B, S, D), jnp.float32)
    key_t = jax.random.normal(k_k, (B, S, D), jnp.float32)
    value = jax.random.normal(k_v, (B, S, D), jnp.float32)

    # causal additive mask: 1 where attention is disallowed (gets * -1e9)
    causal = (jnp.arange(S)[:, None] < jnp.arange(S)[None, :]).astype(jnp.float32)
    mask = jnp.broadcast_to(causal, (B, 1, S, S))

    out, attn_w = mha(query, key_t, value, mask)
    jax.block_until_ready(out)
    jax.block_until_ready(attn_w)

    assert out.shape == (B, S, D)
    assert attn_w.shape == (B, H, S, S)

    # pure-JAX reference (loose tol: softmax uses the EUP approx reciprocal)
    def ref_forward(q, k, v, m):
        def lin(x, w, b):
            return x @ w + b

        qp, kp, vp = (lin(t, mha.weights[i], mha.biases[i])
                      for i, t in enumerate((q, k, v)))

        def split(x):
            return x.reshape(B, S, H, D // H).transpose(0, 2, 1, 3)

        qh, kh, vh = split(qp), split(kp), split(vp)
        s = jnp.einsum("bhqd,bhkd->bhqk", qh, kh) / math.sqrt(D // H)
        s = s + m * (-1.0e9)
        w = jax.nn.softmax(s, axis=-1)
        o = jnp.einsum("bhqk,bhkd->bhqd", w, vh)
        o = o.transpose(0, 2, 1, 3).reshape(B, S, D)
        return lin(o, mha.weights[3], mha.biases[3]), w

    ref_out, ref_w = ref_forward(query, key_t, value, mask)
    assert jnp.allclose(out, ref_out, atol=1e-2, rtol=1e-2)
    assert jnp.allclose(attn_w, ref_w, atol=1e-2, rtol=1e-2)

    print("KERNEL_OK")
</pallas_src>

<mosaic_0001>
module attributes {stable_mosaic.version = 11 : i64} {
  func.func @_linear_kernel(%arg0: i32, %arg1: i32, %arg2: i32, %arg3: memref<16x32xf32, #tpu.memory_space<vmem>>, %arg4: memref<32x32xf32, #tpu.memory_space<vmem>>, %arg5: memref<1x32xf32, #tpu.memory_space<vmem>>, %arg6: memref<16x32xf32, #tpu.memory_space<vmem>>, %arg7: memref<16x32xf32, #tpu.memory_space<vmem>>) attributes {dimension_semantics = [#tpu.dimension_semantics<parallel>, #tpu.dimension_semantics<parallel>, #tpu.dimension_semantics<arbitrary>], iteration_bounds = array<i64: 1, 1, 1>, scalar_prefetch = 0 : i64, scratch_operands = 1 : i64, tpu.core_type = #tpu.core_type<tc>, window_params = [{transform_indices = @transform_0, window_bounds = array<i64: 16, 32>}, {transform_indices = @transform_1, window_bounds = array<i64: 32, 32>}, {transform_indices = @transform_2, window_bounds = array<i64: 1, 32>}, {transform_indices = @transform_3, window_bounds = array<i64: 16, 32>}]} {
    %c0_i32 = arith.constant 0 : i32
    %0 = arith.cmpi eq, %arg2, %c0_i32 : i32
    %1 = arith.extui %0 : i1 to i32
    %c0_i32_0 = arith.constant 0 : i32
    %2 = arith.cmpi ne, %1, %c0_i32_0 : i32
    scf.if %2 {
      %cst_10 = arith.constant 0.000000e+00 : f32
      %12 = vector.broadcast %cst_10 : f32 to vector<16x32xf32>
      %c0_11 = arith.constant 0 : index
      %c0_12 = arith.constant 0 : index
      %13 = vector.load %arg7[%c0_11, %c0_12] : memref<16x32xf32, #tpu.memory_space<vmem>>, vector<16x32xf32>
      tpu.vector_store %arg7[%c0_11, %c0_12], %12 {strides = array<i32>} : memref<16x32xf32, #tpu.memory_space<vmem>>, vector<16x32xf32>,
    } else {
    }
    %c0 = arith.constant 0 : index
    %c0_1 = arith.constant 0 : index
    %3 = vector.load %arg7[%c0, %c0_1] : memref<16x32xf32, #tpu.memory_space<vmem>>, vector<16x32xf32>
    %c0_2 = arith.constant 0 : index
    %c0_3 = arith.constant 0 : index
    %4 = vector.load %arg3[%c0_2, %c0_3] : memref<16x32xf32, #tpu.memory_space<vmem>>, vector<16x32xf32>
    %c0_4 = arith.constant 0 : index
    %c0_5 = arith.constant 0 : index
    %5 = vector.load %arg4[%c0_4, %c0_5] : memref<32x32xf32, #tpu.memory_space<vmem>>, vector<32x32xf32>
    %cst = arith.constant dense<0.000000e+00> : vector<16x32xf32>
    %6 = tpu.matmul %4, %5, %cst {dimension_numbers = #tpu.dot_dimension_numbers<[1], [0], [0], [1], [0, 0, 1, 1], [], []>} : vector<16x32xf32>, vector<32x32xf32>, vector<16x32xf32> -> vector<16x32xf32>
    %7 = arith.addf %3, %6 : vector<16x32xf32>
    %c0_6 = arith.constant 0 : index
    %c0_7 = arith.constant 0 : index
    %8 = vector.load %arg7[%c0_6, %c0_7] : memref<16x32xf32, #tpu.memory_space<vmem>>, vector<16x32xf32>
    tpu.vector_store %arg7[%c0_6, %c0_7], %7 {strides = array<i32>} : memref<16x32xf32, #tpu.memory_space<vmem>>, vector<16x32xf32>,
    %c0_i32_8 = arith.constant 0 : i32
    %9 = arith.cmpi eq, %arg2, %c0_i32_8 : i32
    %10 = arith.extui %9 : i1 to i32
    %c0_i32_9 = arith.constant 0 : i32
    %11 = arith.cmpi ne, %10, %c0_i32_9 : i32
    scf.if %11 {
      %c0_10 = arith.constant 0 : index
      %c0_11 = arith.constant 0 : index
      %12 = vector.load %arg7[%c0_10, %c0_11] : memref<16x32xf32, #tpu.memory_space<vmem>>, vector<16x32xf32>
      %c0_12 = arith.constant 0 : index
      %c0_13 = arith.constant 0 : index
      %13 = vector.load %arg5[%c0_12, %c0_13] : memref<1x32xf32, #tpu.memory_space<vmem>>, vector<1x32xf32>
      %14 = vector.broadcast %13 : vector<1x32xf32> to vector<16x32xf32>
      %15 = arith.addf %12, %14 : vector<16x32xf32>
      %c0_14 = arith.constant 0 : index
      %c0_15 = arith.constant 0 : index
      %16 = vector.load %arg6[%c0_14, %c0_15] : memref<16x32xf32, #tpu.memory_space<vmem>>, vector<16x32xf32>
      tpu.vector_store %arg6[%c0_14, %c0_15], %15 {strides = array<i32>} : memref<16x32xf32, #tpu.memory_space<vmem>>, vector<16x32xf32>,
    } else {
    }
    return
  }
  func.func @transform_0(%arg0: i32, %arg1: i32, %arg2: i32) -> (i32, i32) {
    %c0_i32 = arith.constant 0 : i32
    return %arg0, %arg2 : i32, i32
  }
  func.func @transform_1(%arg0: i32, %arg1: i32, %arg2: i32) -> (i32, i32) {
    %c0_i32 = arith.constant 0 : i32
    return %arg2, %arg1 : i32, i32
  }
  func.func @transform_2(%arg0: i32, %arg1: i32, %arg2: i32) -> (i32, i32) {
    %c0_i32 = arith.constant 0 : i32
    %c0_i32_0 = arith.constant 0 : i32
    return %c0_i32, %arg1 : i32, i32
  }
  func.func @transform_3(%arg0: i32, %arg1: i32, %arg2: i32) -> (i32, i32) {
    %c0_i32 = arith.constant 0 : i32
    return %arg0, %arg1 : i32, i32
  }
}

</mosaic_0001>

<bundles_post_ra>
// kernel: tpu_custom_call.1
= control target key start
LH: loop header
LB: loop body
LE: loop exit
PB: predicated region body
PF: predicated region fallthrough
CT: control target
= control target key end

     0   :  { %8 = vsyncpa [#allocation4], 0  ;;  %s366_s0 = inlined_call_operand.hbm [shape: f32[16,32], index: 0, kind: input, shape index: {}]   ;;  %s367_s1 = inlined_call_operand.hbm [shape: f32[32,32], index: 1, kind: input, shape index: {}]   ;;  %s368_s2 = inlined_call_operand.vmem [shape: f32[1,32], index: 2, kind: input, shape index: {}]   ;;  %s369_s3 = inlined_call_operand.hbm [shape: f32[16,32], index: 3, kind: output, shape index: {}]  }
   0x1   :  { %9 = vsyncpa [#allocation7], 0 }
   0x2   :  { %10 = vsyncpa [#allocation5], 0  ;;  %s284_s12 = smov [#allocation3]   ;;  %s212_s16 = scalar_lea.hbm %s366_s0, 256 }
   0x3   :  { %s16_s13 = sshll.u32 %s284_s12, 4  ;;  %p213_p0 = scmp.ne.s32.totalorder %s366_s0, %s212_s16  ;;  %s17_s13 = int_to_ptr.vmem [resolvable:$true] %s16_s13 }
   0x4   :  { %p216_p1 = scmp.lt.u32.totalorder %s212_s16, %s366_s0 }
   0x6   :  { %p218_p2 = pnand %p216_p1, %p213_p0 }
   0x8   :  { %221 = shalt.err (!%p218_p2)
}
   0x9   :  { %s222_s21 = scalar_lea.vmem %s17_s13, 256  ;;  %p227_p4 = scmp.lt.s32.totalorder %s17_s13, %s17_s13 }
   0xa   :  { %p223_p3 = scmp.ne.s32.totalorder %s17_s13, %s222_s21  ;;  %p228_p5 = scmp.lt.s32.totalorder %s222_s21, %s222_s21 }
   0xc   :  { %p229_p6 = por %p228_p5, %p227_p4 }
   0xe   :  { %p230_p7 = pnand %p229_p6, %p223_p3 }
  0x10   :  { %233 = shalt.err (!%p230_p7)
}
  0x11   :  { %s285_s22 = smov 128   ;;  %s286_s23 = smov 8  }
  0x12   :  { %22 = dma.hbm_to_vmem [thread:$0]  %s366_s0, 256, %s17_s13, [#allocation4], %s285_s22, %s285_s22, %s286_s23  }
  0x13   :  { %s287_s26 = smov [#allocation6]   ;;  %s234_s30 = scalar_lea.hbm %s367_s1, 512 }
  0x14   :  { %s28_s27 = sshll.u32 %s287_s26, 4  ;;  %p235_p8 = scmp.ne.s32.totalorder %s367_s1, %s234_s30  ;;  %s29_s27 = int_to_ptr.vmem [resolvable:$true] %s28_s27 }
  0x15   :  { %p238_p9 = scmp.lt.u32.totalorder %s234_s30, %s367_s1 }
  0x17   :  { %p240_p10 = pnand %p238_p9, %p235_p8 }
  0x19   :  { %243 = shalt.err (!%p240_p10)
}
  0x1a   :  { %s244_s8 = scalar_lea.vmem %s29_s27, 512  ;;  %p249_p12 = scmp.lt.s32.totalorder %s29_s27, %s29_s27 }
  0x1b   :  { %p245_p11 = scmp.ne.s32.totalorder %s29_s27, %s244_s8  ;;  %p250_p13 = scmp.lt.s32.totalorder %s244_s8, %s244_s8 }
  0x1d   :  { %p251_p0 = por %p250_p13, %p249_p12 }
  0x1f   :  { %p252_p1 = pnand %p251_p0, %p245_p11 }
  0x21   :  { %255 = shalt.err (!%p252_p1)
}
  0x22   :  { %34 = dma.hbm_to_vmem [thread:$0]  %s367_s1, 512, %s29_s27, [#allocation7], %s285_s22, %s285_s22, %s286_s23  }
  0x23   :  { %278 = dma.done.wait [#allocation4], 256  }
  0x24   :  { %279 = vsyncadd [#allocation4], 4294967040 }
  0x25   :  { %280 = dma.done.wait [#allocation7], 512  }
  0x26   :  { %281 = vsyncadd [#allocation7], 4294966784  ;;  %vm47_vm0 = vcmask 261120   ;;  %v288_v0 = vmov 0.0   ;;  %v54_v1 = vld [vmem:[#allocation6] sm:$0xff]  ;;  %v55_v2 = vld [vmem:[#allocation6 + $0x8] sm:$0xff] }
  0x27   :  { %49 = vst.msk [vmem:[#allocation2 + $0x8] sm:$0xff] %vm47_vm0, %v288_v0  ;;  %48 = vst.msk [vmem:[#allocation2] sm:$0xff] %vm47_vm0, %v288_v0  ;;  %v56_v3 = vld [vmem:[#allocation6 + $0x10] sm:$0xff]  ;;  %v198_v4 = vpack.c.bf16 %v55_v2, %v54_v1  ;;  %v57_v5 = vld [vmem:[#allocation6 + $0x18] sm:$0xff]  ;;  %s289_s11 = smov [#allocation8]  }
  0x28   :  { %v52_v6 = vld [vmem:[#allocation3] sm:$0xff]  ;;  %v202_v7 = vpack.c.bf16 %v57_v5, %v56_v3  ;;  %v53_v8 = vld [vmem:[#allocation3 + $0x8] sm:$0xff]  ;;  %v180_v15 = vld [vmem:[%s368_s2] ss:$0 sm:$0xff]  ;;  %s165_s12 = sshll.u32 %s289_s11, 4  ;;  %s166_s12 = int_to_ptr.vmem [resolvable:$true] %s165_s12 }
  0x29   :  { %195 = vmatprep.mubr.msk.f32.mxu0 %vm47_vm0, %v52_v6  ;;  %199 = vmatprep.subr.bf16.mxu0 %v198_v4  ;;  %s256_s13 = scalar_lea.vmem %s166_s12, 256  ;;  %p261_p3 = scmp.lt.s32.totalorder %s166_s12, %s166_s12 }
  0x2a   :  { %201 = vmatpush3.bf16.msra.mxu0 %v198_v4  ;;  %p257_p2 = scmp.ne.s32.totalorder %s166_s12, %s256_s13  ;;  %p262_p4 = scmp.lt.s32.totalorder %s256_s13, %s256_s13 }
  0x2b   :  { %203 = vmatprep.subr.bf16.mxu0 %v202_v7 }
  0x2c   :  { %p263_p5 = por %p262_p4, %p261_p3 }
  0x2e   :  { %205 = vmatpush3.bf16.msra.mxu0 %v202_v7  ;;  %v51_v9 = vld [vmem:[#allocation2 + $0x8] sm:$0xff]  ;;  %v50_v10 = vld [vmem:[#allocation2] sm:$0xff]  ;;  %p264_p6 = pnand %p263_p5, %p257_p2 }
  0x31   :  { %196 = vmatmul.mubr.msk.f32.vlgmr.msra.gmra.mrb[0].mxu0 %vm47_vm0, %v53_v8 }
 0x104   :  { %v197_v11 = vpop.f32.mrb[0].mxu0 }
 0x105   :  { %v141_v12 = vadd.f32 %v197_v11, %v51_v9  ;;  %v131_v13 = vpop.f32.mrb[1].mxu0 }
 0x106   :  { %v140_v14 = vadd.f32 %v131_v13, %v50_v10 }
 0x107   :  { %143 = vst.msk [vmem:[#allocation2 + $0x8] sm:$0xff] %vm47_vm0, %v141_v12 }
 0x108   :  { %142 = vst.msk [vmem:[#allocation2] sm:$0xff] %vm47_vm0, %v140_v14 }
 0x10e   :  { %v148_v16 = vld [vmem:[#allocation2 + $0x8] sm:$0xff] }
 0x10f   :  { %v147_v17 = vld [vmem:[#allocation2] sm:$0xff]  ;;  %v157_v18 = vadd.f32 %v180_v15, %v148_v16 }
 0x110   :  { %v156_v19 = vadd.f32 %v180_v15, %v147_v17 }
 0x111   :  { %159 = vst.msk [vmem:[#allocation8 + $0x8] sm:$0xff] %vm47_vm0, %v157_v18 }
 0x112   :  { %158 = vst.msk [vmem:[#allocation8] sm:$0xff] %vm47_vm0, %v156_v19 }
 0x113   :  { %267 = shalt.err (!%p264_p6)
}
 0x114   :  { %s268_s15 = scalar_lea.hbm %s369_s3, 256 }
 0x115   :  { %p269_p7 = scmp.ne.s32.totalorder %s369_s3, %s268_s15  ;;  %p272_p8 = scmp.lt.u32.totalorder %s268_s15, %s369_s3 }
 0x117   :  { %p274_p9 = pnand %p272_p8, %p269_p7 }
 0x119   :  { %277 = shalt.err (!%p274_p9)
}
 0x11a   :  { %171 = dma.vmem_to_hbm [thread:$0]  %s166_s12, 256, %s369_s3, [#allocation5], %s285_s22, %s285_s22, %s286_s23  }
 0x11b   :  { %282 = dma.done.wait [#allocation5], 256  }
 0x11c   :  { %283 = vsyncadd [#allocation5], 4294967040 }
 0x11d   :  { %175 = vsyncpa [#allocation4], 1 }
 0x11e   :  { %176 = vsyncpa [#allocation7], 1 }
 0x11f   :  { %177 = vsyncpa [#allocation5], 1 }

</bundles_post_ra>
